<compile_context>
chip_gen: v6e
topology: v6e:2x2x1
jax: 0.10.0
libtpu: 0.0.40
codegen_flags: <defaults>
</compile_context>

<pallas_src>
import functools

import jax
import jax.numpy as jnp
from jax.experimental import pallas as pl
from jax.experimental.pallas import tpu as pltpu


def _tsm_conv1x1_kernel(x_ref, w_ref, b_ref, o_ref, *, T, fold):
    # x_ref: (1, T, C, hw_tile) input dtype (cast to bf16 in-kernel if needed)
    # w_ref: (C_out, C) bf16     b_ref: (C_out, 1) f32
    # o_ref: (1, T, C_out, hw_tile) out dtype
    c_out, c = w_ref.shape
    hw_t = o_ref.shape[-1]
    has_right = (2 * fold) < c

    # Static split of the resident 1x1-conv weight:
    #   columns [0:fold)       multiply channels taken from frame t+1 (zero at last frame)
    #   columns [fold:2*fold)  multiply channels taken from frame t-1 (zero at first frame)
    #   columns [2*fold:)      multiply the unshifted channels of frame t
    w = w_ref[...]
    if has_right:
        w_right = w[:, 2 * fold:]
    if T > 1:
        w_left = w[:, :fold]
        w_mid = w[:, fold:2 * fold]

    def as_bf16(v):
        return v if v.dtype == jnp.bfloat16 else v.astype(jnp.bfloat16)

    # Bias broadcast hoisted out of the unrolled T loop (f32 accumulation path).
    bias = jnp.broadcast_to(b_ref[...], (c_out, hw_t)).astype(jnp.float32)

    # T is small and static -> fully unrolled loop, visible to the scheduler.
    for t in range(T):
        if has_right:
            acc = bias + jnp.dot(w_right, as_bf16(x_ref[0, t, 2 * fold:, :]),
                                 preferred_element_type=jnp.float32)
        else:
            acc = bias
        if t + 1 < T:   # first `fold` output channels read frame t+1
            acc = acc + jnp.dot(w_left, as_bf16(x_ref[0, t + 1, :fold, :]),
                                preferred_element_type=jnp.float32)
        if t > 0:       # next `fold` output channels read frame t-1
            acc = acc + jnp.dot(w_mid, as_bf16(x_ref[0, t - 1, fold:2 * fold, :]),
                                preferred_element_type=jnp.float32)
        o_ref[0, t] = acc.astype(o_ref.dtype)


def _block_bytes(hw_tile, T, c_in, c_out, in_itemsize, out_itemsize):
    # One (input + output) block at this tile width (single buffer).
    return T * hw_tile * (c_in * in_itemsize + c_out * out_itemsize)


def _plan_hw(hw, T, c_in, c_out, in_itemsize, out_itemsize,
             *, target=1024, block_budget_bytes=6 << 20):
    """Return (hw_padded, hw_tile).

    Prefers lane-aligned tiles (multiples of 128) that exactly divide the HW extent.
    If HW is not a multiple of 128:
      * small maps whose full-extent block fits the budget keep a single full block;
      * large maps are padded up to the next multiple of 128 so they can be tiled.
    Budget keeps the double-buffered in+out working set well under the 32 MiB scoped
    VMEM limit requested below (safe on v5e/v6e 128 MiB and v7x 64 MiB).
    """
    def fits(t):
        return _block_bytes(t, T, c_in, c_out, in_itemsize, out_itemsize) <= block_budget_bytes

    if hw % 128 != 0:
        if fits(hw):
            return hw, hw                      # one full-width block per sample
        hw = ((hw + 127) // 128) * 128         # pad so HW can be lane-aligned & tiled

    n128 = hw // 128
    cap = max(128, (target // 128) * 128)
    best = 128
    for g in range(1, n128 + 1):
        if n128 % g != 0:
            continue
        t = 128 * g
        if t <= cap and fits(t):
            best = max(best, t)
    return hw, best


def temporal_shift_conv1x1(x, w, b, *, num_segments, shift_div, hw_tile_target=1024):
    """TemporalShift.shift followed by a 1x1 Conv2d (the wrapped `net`).

    x: [N, C, H, W] with N = batch * num_segments
    w: [C_out, C_in]   (1x1 conv weight, squeezed)
    b: [C_out]
    returns [N, C_out, H, W]
    """
    n, c, h, wd = x.shape
    assert n % num_segments == 0, "batch dim must be batch * num_segments"
    B = n // num_segments
    T = num_segments
    HW = h * wd
    fold = c // shift_div
    assert fold >= 1, "channels must be >= shift_div"
    assert 2 * fold <= c, "need 2 * (C // shift_div) <= C"
    c_out = w.shape[0]
    out_dtype = x.dtype

    # Activations keep their original dtype (bf16 cast happens inside the kernel).
    # Weights/bias are tiny; cast once here.
    xr = x.reshape(B, T, c, HW)
    wb = w.astype(jnp.bfloat16)
    b2 = b.reshape(c_out, 1).astype(jnp.float32)

    hw_pad, hw_tile = _plan_hw(
        HW, T, c, c_out, xr.dtype.itemsize, jnp.dtype(out_dtype).itemsize,
        target=hw_tile_target)
    if hw_pad != HW:
        xr = jnp.pad(xr, ((0, 0), (0, 0), (0, 0), (0, hw_pad - HW)))
    n_hw = pl.cdiv(hw_pad, hw_tile)

    kernel = functools.partial(_tsm_conv1x1_kernel, T=T, fold=fold)

    out = pl.pallas_call(
        kernel,
        out_shape=jax.ShapeDtypeStruct((B, T, c_out, hw_pad), out_dtype),
        grid_spec=pltpu.PrefetchScalarGridSpec(
            num_scalar_prefetch=0,
            grid=(B, n_hw),
            in_specs=[
                pl.BlockSpec((1, T, c, hw_tile), lambda bi, hi: (bi, 0, 0, hi)),
                # Weights / bias: constant index_map -> resident in VMEM, not re-DMA'd.
                pl.BlockSpec((c_out, c), lambda bi, hi: (0, 0)),
                pl.BlockSpec((c_out, 1), lambda bi, hi: (0, 0)),
            ],
            out_specs=pl.BlockSpec((1, T, c_out, hw_tile),
                                   lambda bi, hi: (bi, 0, 0, hi)),
        ),
        compiler_params=pltpu.CompilerParams(
            dimension_semantics=("parallel", "parallel"),
            vmem_limit_bytes=32 * 1024 * 1024,
        ),
    )(xr, wb, b2)

    if hw_pad != HW:
        out = out[..., :HW]
    return out.reshape(n, c_out, h, wd)


def _reference(x, w, b, *, num_segments, shift_div):
    """Pure-JAX reference matching the PyTorch semantics exactly (f32 math)."""
    n, c, h, wd = x.shape
    xr = x.reshape(-1, num_segments, c, h * wd)
    fold = c // shift_div
    left = xr[:, :, :fold, :]
    mid = xr[:, :, fold:2 * fold, :]
    right = xr[:, :, 2 * fold:, :]
    blank_l = jnp.zeros_like(left[:, :1])
    left = jnp.concatenate([left[:, 1:], blank_l], axis=1)
    blank_m = jnp.zeros_like(mid[:, :1])
    mid = jnp.concatenate([blank_m, mid[:, :-1]], axis=1)
    shifted = jnp.concatenate([left, mid, right], axis=2).reshape(n, c, h, wd)
    out = jnp.einsum("oc,nchw->nohw", w, shifted,
                     precision=jax.lax.Precision.HIGHEST)
    return out + b[None, :, None, None]


def _check_case(key, *, batch, num_segments, shift_div, C, H, W, C_out):
    N = batch * num_segments
    kx, kw, kb = jax.random.split(key, 3)
    x = jax.random.normal(kx, (N, C, H, W), dtype=jnp.float32)
    w = jax.random.normal(kw, (C_out, C), dtype=jnp.float32) * 0.1
    b = jax.random.normal(kb, (C_out,), dtype=jnp.float32) * 0.1

    out = temporal_shift_conv1x1(
        x, w, b, num_segments=num_segments, shift_div=shift_div)
    out = jax.block_until_ready(out)
    assert out.shape == (N, C_out, H, W)

    # Strict check: reference fed the same bf16-rounded matmul operands (f32 math).
    x_bf = x.astype(jnp.bfloat16).astype(jnp.float32)
    w_bf = w.astype(jnp.bfloat16).astype(jnp.float32)
    ref_bf = _reference(x_bf, w_bf, b, num_segments=num_segments, shift_div=shift_div)
    assert jnp.allclose(out, ref_bf, atol=1e-3, rtol=1e-3), \
        "mismatch vs bf16-operand reference"

    # Loose check: full-f32 reference (bf16 matmul operands cost some precision).
    ref_f32 = _reference(x, w, b, num_segments=num_segments, shift_div=shift_div)
    assert jnp.allclose(out, ref_f32, atol=6e-2, rtol=6e-2), \
        "mismatch vs f32 reference"


if __name__ == "__main__":
    key = jax.random.PRNGKey(0)
    k1, k2 = jax.random.split(key)

    # Main case: batch=2, num_segments=4 -> N=8 frames, C=16, 16x16 spatial,
    # shift_div=8 -> fold=2, conv out channels=32 (lane-aligned HW tile path).
    _check_case(k1, batch=2, num_segments=4, shift_div=8, C=16, H=16, W=16, C_out=32)

    # Small odd spatial map (9x9 -> HW=81): single full-width block, masked stores,
    # module defaults num_segments=3 / shift_div=3.
    _check_case(k2, batch=1, num_segments=3, shift_div=3, C=12, H=9, W=9, C_out=8)

    # TODO(synk): TemporalShift wraps an arbitrary `net`; only the 1x1-Conv2d case
    # (its use inside ResNet-TSM bottlenecks) is fused here.
    print("KERNEL_OK")
</pallas_src>

<mosaic_0001>
module attributes {stable_mosaic.version = 11 : i64} {
  func.func @_tsm_conv1x1_kernel(%arg0: i32, %arg1: i32, %arg2: memref<1x4x16x256xf32, #tpu.memory_space<vmem>>, %arg3: memref<32x16xbf16, #tpu.memory_space<vmem>>, %arg4: memref<32x1xf32, #tpu.memory_space<vmem>>, %arg5: memref<1x4x32x256xf32, #tpu.memory_space<vmem>>) attributes {dimension_semantics = [#tpu.dimension_semantics<parallel>, #tpu.dimension_semantics<parallel>], iteration_bounds = array<i64: 2, 1>, scalar_prefetch = 0 : i64, scratch_operands = 0 : i64, tpu.core_type = #tpu.core_type<tc>, window_params = [{transform_indices = @transform_0, window_bounds = array<i64: 1, 4, 16, 256>}, {pipeline_mode = #tpu.pipeline_mode<synchronous>, transform_indices = @transform_1, window_bounds = array<i64: 32, 16>}, {pipeline_mode = #tpu.pipeline_mode<synchronous>, transform_indices = @transform_2, window_bounds = array<i64: 32, 1>}, {transform_indices = @transform_3, window_bounds = array<i64: 1, 4, 32, 256>}]} {
    %c0 = arith.constant 0 : index
    %c0_0 = arith.constant 0 : index
    %0 = vector.load %arg3[%c0, %c0_0] : memref<32x16xbf16, #tpu.memory_space<vmem>>, vector<32x16xbf16>
    %1 = vector.extract_strided_slice %0 {offsets = [0, 4], sizes = [32, 12], strides = [1, 1]} : vector<32x16xbf16> to vector<32x12xbf16>
    %2 = vector.extract_strided_slice %0 {offsets = [0, 0], sizes = [32, 2], strides = [1, 1]} : vector<32x16xbf16> to vector<32x2xbf16>
    %3 = vector.extract_strided_slice %0 {offsets = [0, 2], sizes = [32, 2], strides = [1, 1]} : vector<32x16xbf16> to vector<32x2xbf16>
    %c0_1 = arith.constant 0 : index
    %c0_2 = arith.constant 0 : index
    %4 = vector.load %arg4[%c0_1, %c0_2] : memref<32x1xf32, #tpu.memory_space<vmem>>, vector<32x1xf32>
    %5 = vector.shape_cast %4 : vector<32x1xf32> to vector<32x1xf32>
    %6 = vector.broadcast %5 : vector<32x1xf32> to vector<32x256xf32>
    %c0_3 = arith.constant 0 : index
    %c0_4 = arith.constant 0 : index
    %c4 = arith.constant 4 : index
    %c0_5 = arith.constant 0 : index
    %7 = vector.load %arg2[%c0_3, %c0_4, %c4, %c0_5] : memref<1x4x16x256xf32, #tpu.memory_space<vmem>>, vector<1x1x12x256xf32>
    %8 = vector.shape_cast %7 : vector<1x1x12x256xf32> to vector<12x256xf32>
    %9 = arith.truncf %8 : vector<12x256xf32> to vector<12x256xbf16>
    %cst = arith.constant dense<0.000000e+00> : vector<32x256xf32>
    %10 = tpu.matmul %1, %9, %cst {dimension_numbers = #tpu.dot_dimension_numbers<[1], [0], [0], [1], [0, 0, 1, 1], [], []>} : vector<32x12xbf16>, vector<12x256xbf16>, vector<32x256xf32> -> vector<32x256xf32>
    %11 = arith.addf %6, %10 : vector<32x256xf32>
    %c0_6 = arith.constant 0 : index
    %c1 = arith.constant 1 : index
    %c0_7 = arith.constant 0 : index
    %c0_8 = arith.constant 0 : index
    %12 = vector.load %arg2[%c0_6, %c1, %c0_7, %c0_8] : memref<1x4x16x256xf32, #tpu.memory_space<vmem>>, vector<1x1x2x256xf32>
    %13 = vector.shape_cast %12 : vector<1x1x2x256xf32> to vector<2x256xf32>
    %14 = arith.truncf %13 : vector<2x256xf32> to vector<2x256xbf16>
    %cst_9 = arith.constant dense<0.000000e+00> : vector<32x256xf32>
    %15 = tpu.matmul %2, %14, %cst_9 {dimension_numbers = #tpu.dot_dimension_numbers<[1], [0], [0], [1], [0, 0, 1, 1], [], []>} : vector<32x2xbf16>, vector<2x256xbf16>, vector<32x256xf32> -> vector<32x256xf32>
    %16 = arith.addf %11, %15 : vector<32x256xf32>
    %c0_10 = arith.constant 0 : index
    %c0_11 = arith.constant 0 : index
    %c0_12 = arith.constant 0 : index
    %c0_13 = arith.constant 0 : index
    %17 = vector.load %arg5[%c0_10, %c0_11, %c0_12, %c0_13] : memref<1x4x32x256xf32, #tpu.memory_space<vmem>>, vector<1x1x32x256xf32>
    %18 = vector.shape_cast %17 : vector<1x1x32x256xf32> to vector<32x256xf32>
    %19 = vector.shape_cast %16 : vector<32x256xf32> to vector<1x1x32x256xf32>
    tpu.vector_store %arg5[%c0_10, %c0_11, %c0_12, %c0_13], %19 {strides = array<i32>} : memref<1x4x32x256xf32, #tpu.memory_space<vmem>>, vector<1x1x32x256xf32>,
    %c0_14 = arith.constant 0 : index
    %c1_15 = arith.constant 1 : index
    %c4_16 = arith.constant 4 : index
    %c0_17 = arith.constant 0 : index
    %20 = vector.load %arg2[%c0_14, %c1_15, %c4_16, %c0_17] : memref<1x4x16x256xf32, #tpu.memory_space<vmem>>, vector<1x1x12x256xf32>
    %21 = vector.shape_cast %20 : vector<1x1x12x256xf32> to vector<12x256xf32>
    %22 = arith.truncf %21 : vector<12x256xf32> to vector<12x256xbf16>
    %cst_18 = arith.constant dense<0.000000e+00> : vector<32x256xf32>
    %23 = tpu.matmul %1, %22, %cst_18 {dimension_numbers = #tpu.dot_dimension_numbers<[1], [0], [0], [1], [0, 0, 1, 1], [], []>} : vector<32x12xbf16>, vector<12x256xbf16>, vector<32x256xf32> -> vector<32x256xf32>
    %24 = arith.addf %6, %23 : vector<32x256xf32>
    %c0_19 = arith.constant 0 : index
    %c2 = arith.constant 2 : index
    %c0_20 = arith.constant 0 : index
    %c0_21 = arith.constant 0 : index
    %25 = vector.load %arg2[%c0_19, %c2, %c0_20, %c0_21] : memref<1x4x16x256xf32, #tpu.memory_space<vmem>>, vector<1x1x2x256xf32>
    %26 = vector.shape_cast %25 : vector<1x1x2x256xf32> to vector<2x256xf32>
    %27 = arith.truncf %26 : vector<2x256xf32> to vector<2x256xbf16>
    %cst_22 = arith.constant dense<0.000000e+00> : vector<32x256xf32>
    %28 = tpu.matmul %2, %27, %cst_22 {dimension_numbers = #tpu.dot_dimension_numbers<[1], [0], [0], [1], [0, 0, 1, 1], [], []>} : vector<32x2xbf16>, vector<2x256xbf16>, vector<32x256xf32> -> vector<32x256xf32>
    %29 = arith.addf %24, %28 : vector<32x256xf32>
    %c0_23 = arith.constant 0 : index
    %c0_24 = arith.constant 0 : index
    %c2_25 = arith.constant 2 : index
    %c0_26 = arith.constant 0 : index
    %30 = vector.load %arg2[%c0_23, %c0_24, %c2_25, %c0_26] : memref<1x4x16x256xf32, #tpu.memory_space<vmem>>, vector<1x1x2x256xf32>
    %31 = vector.shape_cast %30 : vector<1x1x2x256xf32> to vector<2x256xf32>
    %32 = arith.truncf %31 : vector<2x256xf32> to vector<2x256xbf16>
    %cst_27 = arith.constant dense<0.000000e+00> : vector<32x256xf32>
    %33 = tpu.matmul %3, %32, %cst_27 {dimension_numbers = #tpu.dot_dimension_numbers<[1], [0], [0], [1], [0, 0, 1, 1], [], []>} : vector<32x2xbf16>, vector<2x256xbf16>, vector<32x256xf32> -> vector<32x256xf32>
    %34 = arith.addf %29, %33 : vector<32x256xf32>
    %c0_28 = arith.constant 0 : index
    %c1_29 = arith.constant 1 : index
    %c0_30 = arith.constant 0 : index
    %c0_31 = arith.constant 0 : index
    %35 = vector.load %arg5[%c0_28, %c1_29, %c0_30, %c0_31] : memref<1x4x32x256xf32, #tpu.memory_space<vmem>>, vector<1x1x32x256xf32>
    %36 = vector.shape_cast %35 : vector<1x1x32x256xf32> to vector<32x256xf32>
    %37 = vector.shape_cast %34 : vector<32x256xf32> to vector<1x1x32x256xf32>
    tpu.vector_store %arg5[%c0_28, %c1_29, %c0_30, %c0_31], %37 {strides = array<i32>} : memref<1x4x32x256xf32, #tpu.memory_space<vmem>>, vector<1x1x32x256xf32>,
    %c0_32 = arith.constant 0 : index
    %c2_33 = arith.constant 2 : index
    %c4_34 = arith.constant 4 : index
    %c0_35 = arith.constant 0 : index
    %38 = vector.load %arg2[%c0_32, %c2_33, %c4_34, %c0_35] : memref<1x4x16x256xf32, #tpu.memory_space<vmem>>, vector<1x1x12x256xf32>
    %39 = vector.shape_cast %38 : vector<1x1x12x256xf32> to vector<12x256xf32>
    %40 = arith.truncf %39 : vector<12x256xf32> to vector<12x256xbf16>
    %cst_36 = arith.constant dense<0.000000e+00> : vector<32x256xf32>
    %41 = tpu.matmul %1, %40, %cst_36 {dimension_numbers = #tpu.dot_dimension_numbers<[1], [0], [0], [1], [0, 0, 1, 1], [], []>} : vector<32x12xbf16>, vector<12x256xbf16>, vector<32x256xf32> -> vector<32x256xf32>
    %42 = arith.addf %6, %41 : vector<32x256xf32>
    %c0_37 = arith.constant 0 : index
    %c3 = arith.constant 3 : index
    %c0_38 = arith.constant 0 : index
    %c0_39 = arith.constant 0 : index
    %43 = vector.load %arg2[%c0_37, %c3, %c0_38, %c0_39] : memref<1x4x16x256xf32, #tpu.memory_space<vmem>>, vector<1x1x2x256xf32>
    %44 = vector.shape_cast %43 : vector<1x1x2x256xf32> to vector<2x256xf32>
    %45 = arith.truncf %44 : vector<2x256xf32> to vector<2x256xbf16>
    %cst_40 = arith.constant dense<0.000000e+00> : vector<32x256xf32>
    %46 = tpu.matmul %2, %45, %cst_40 {dimension_numbers = #tpu.dot_dimension_numbers<[1], [0], [0], [1], [0, 0, 1, 1], [], []>} : vector<32x2xbf16>, vector<2x256xbf16>, vector<32x256xf32> -> vector<32x256xf32>
    %47 = arith.addf %42, %46 : vector<32x256xf32>
    %c0_41 = arith.constant 0 : index
    %c1_42 = arith.constant 1 : index
    %c2_43 = arith.constant 2 : index
    %c0_44 = arith.constant 0 : index
    %48 = vector.load %arg2[%c0_41, %c1_42, %c2_43, %c0_44] : memref<1x4x16x256xf32, #tpu.memory_space<vmem>>, vector<1x1x2x256xf32>
    %49 = vector.shape_cast %48 : vector<1x1x2x256xf32> to vector<2x256xf32>
    %50 = arith.truncf %49 : vector<2x256xf32> to vector<2x256xbf16>
    %cst_45 = arith.constant dense<0.000000e+00> : vector<32x256xf32>
    %51 = tpu.matmul %3, %50, %cst_45 {dimension_numbers = #tpu.dot_dimension_numbers<[1], [0], [0], [1], [0, 0, 1, 1], [], []>} : vector<32x2xbf16>, vector<2x256xbf16>, vector<32x256xf32> -> vector<32x256xf32>
    %52 = arith.addf %47, %51 : vector<32x256xf32>
    %c0_46 = arith.constant 0 : index
    %c2_47 = arith.constant 2 : index
    %c0_48 = arith.constant 0 : index
    %c0_49 = arith.constant 0 : index
    %53 = vector.load %arg5[%c0_46, %c2_47, %c0_48, %c0_49] : memref<1x4x32x256xf32, #tpu.memory_space<vmem>>, vector<1x1x32x256xf32>
    %54 = vector.shape_cast %53 : vector<1x1x32x256xf32> to vector<32x256xf32>
    %55 = vector.shape_cast %52 : vector<32x256xf32> to vector<1x1x32x256xf32>
    tpu.vector_store %arg5[%c0_46, %c2_47, %c0_48, %c0_49], %55 {strides = array<i32>} : memref<1x4x32x256xf32, #tpu.memory_space<vmem>>, vector<1x1x32x256xf32>,
    %c0_50 = arith.constant 0 : index
    %c3_51 = arith.constant 3 : index
    %c4_52 = arith.constant 4 : index
    %c0_53 = arith.constant 0 : index
    %56 = vector.load %arg2[%c0_50, %c3_51, %c4_52, %c0_53] : memref<1x4x16x256xf32, #tpu.memory_space<vmem>>, vector<1x1x12x256xf32>
    %57 = vector.shape_cast %56 : vector<1x1x12x256xf32> to vector<12x256xf32>
    %58 = arith.truncf %57 : vector<12x256xf32> to vector<12x256xbf16>
    %cst_54 = arith.constant dense<0.000000e+00> : vector<32x256xf32>
    %59 = tpu.matmul %1, %58, %cst_54 {dimension_numbers = #tpu.dot_dimension_numbers<[1], [0], [0], [1], [0, 0, 1, 1], [], []>} : vector<32x12xbf16>, vector<12x256xbf16>, vector<32x256xf32> -> vector<32x256xf32>
    %60 = arith.addf %6, %59 : vector<32x256xf32>
    %c0_55 = arith.constant 0 : index
    %c2_56 = arith.constant 2 : index
    %c2_57 = arith.constant 2 : index
    %c0_58 = arith.constant 0 : index
    %61 = vector.load %arg2[%c0_55, %c2_56, %c2_57, %c0_58] : memref<1x4x16x256xf32, #tpu.memory_space<vmem>>, vector<1x1x2x256xf32>
    %62 = vector.shape_cast %61 : vector<1x1x2x256xf32> to vector<2x256xf32>
    %63 = arith.truncf %62 : vector<2x256xf32> to vector<2x256xbf16>
    %cst_59 = arith.constant dense<0.000000e+00> : vector<32x256xf32>
    %64 = tpu.matmul %3, %63, %cst_59 {dimension_numbers = #tpu.dot_dimension_numbers<[1], [0], [0], [1], [0, 0, 1, 1], [], []>} : vector<32x2xbf16>, vector<2x256xbf16>, vector<32x256xf32> -> vector<32x256xf32>
    %65 = arith.addf %60, %64 : vector<32x256xf32>
    %c0_60 = arith.constant 0 : index
    %c3_61 = arith.constant 3 : index
    %c0_62 = arith.constant 0 : index
    %c0_63 = arith.constant 0 : index
    %66 = vector.load %arg5[%c0_60, %c3_61, %c0_62, %c0_63] : memref<1x4x32x256xf32, #tpu.memory_space<vmem>>, vector<1x1x32x256xf32>
    %67 = vector.shape_cast %66 : vector<1x1x32x256xf32> to vector<32x256xf32>
    %68 = vector.shape_cast %65 : vector<32x256xf32> to vector<1x1x32x256xf32>
    tpu.vector_store %arg5[%c0_60, %c3_61, %c0_62, %c0_63], %68 {strides = array<i32>} : memref<1x4x32x256xf32, #tpu.memory_space<vmem>>, vector<1x1x32x256xf32>,
    return
  }
  func.func @transform_0(%arg0: i32, %arg1: i32) -> (i32, i32, i32, i32) {
    %c0_i32 = arith.constant 0 : i32
    %c0_i32_0 = arith.constant 0 : i32
    %c0_i32_1 = arith.constant 0 : i32
    return %arg0, %c0_i32, %c0_i32_0, %arg1 : i32, i32, i32, i32
  }
  func.func @transform_1(%arg0: i32, %arg1: i32) -> (i32, i32) {
    %c0_i32 = arith.constant 0 : i32
    %c0_i32_0 = arith.constant 0 : i32
    %c0_i32_1 = arith.constant 0 : i32
    return %c0_i32, %c0_i32_0 : i32, i32
  }
  func.func @transform_2(%arg0: i32, %arg1: i32) -> (i32, i32) {
    %c0_i32 = arith.constant 0 : i32
    %c0_i32_0 = arith.constant 0 : i32
    %c0_i32_1 = arith.constant 0 : i32
    return %c0_i32, %c0_i32_0 : i32, i32
  }
  func.func @transform_3(%arg0: i32, %arg1: i32) -> (i32, i32, i32, i32) {
    %c0_i32 = arith.constant 0 : i32
    %c0_i32_0 = arith.constant 0 : i32
    %c0_i32_1 = arith.constant 0 : i32
    return %arg0, %c0_i32, %c0_i32_0, %arg1 : i32, i32, i32, i32
  }
}

</mosaic_0001>

<bundles_post_ra>
// kernel: tpu_custom_call.1
= control target key start
LH: loop header
LB: loop body
LE: loop exit
PB: predicated region body
PF: predicated region fallthrough
CT: control target
= control target key end

     0   :  { %8 = vsyncpa [#allocation3], 0  ;;  %s1881_s0 = inlined_call_operand.hbm [shape: f32[2,4,16,256], index: 0, kind: input, shape index: {}]   ;;  %s1882_s1 = inlined_call_operand.vmem [shape: bf16[32,16], index: 1, kind: input, shape index: {}]   ;;  %s1883_s2 = inlined_call_operand.vmem [shape: f32[32,1], index: 2, kind: input, shape index: {}]   ;;  %s1884_s3 = inlined_call_operand.hbm [shape: f32[2,4,32,256], index: 3, kind: output, shape index: {}]  }
   0x1   :  { %10 = vsyncpa [#allocation3 + $0x1], 0 }
   0x2   :  { %11 = vsyncpa [#allocation4], 0 }
   0x3   :  { %13 = vsyncpa [#allocation4 + $0x1], 0  ;;  %s1472_s12 = smov 0   ;;  %s1474_s13 = smov 0  }
   0x4   :  { %s1476_s14 = smov 0   ;;  %s1478_s15 = smov 0  }
   0x5   :  { %s1480_s16 = smov 0   ;;  %s1482_s17 = smov 0  }
   0x6 LB: > { %s1165_s18 = sadd.s32 4294967295, %s1441_s17   ;;  %s1166_s19 = sadd.s32 4294967294, %s1441_s17   ;;  %s1441_s17 = sphi %s1482_s17, %s19_s17   ;;  %s1437_s16 = sphi %s1480_s16, %s1895_s16   ;;  %s1433_s15 = sphi %s1478_s15, %s1894_s15   ;;  %s1429_s14 = sphi %s1476_s14, %s1893_s14   ;;  %s1425_s13 = sphi %s1474_s13, %s1892_s13   ;;  %s1421_s12 = sphi %s1472_s12, %s1891_s12  }
   0x7   : > { %s31_s20 = sadd.s32 1, %s1437_s16  ;;  %s40_s21 = sadd.s32 1, %s1429_s14 }
   0x8   : > { %p33_p0 = scmp.ge.s32.totalorder %s31_s20, 2  ;;  %p47_p1 = scmp.ne.s32.totalorder %s1429_s14, %s1425_s13 }
   0x9   : > { %p48_p2 = scmp.eq.s32.totalorder %s1441_s17, 0  ;;  %p53_p3 = scmp.ne.s32.totalorder %s1425_s13, %s1421_s12 }
   0xa   : > { %s1897_s20 = smov (%p33_p0, %s31_s20), 0  ;;  %p54_p5 = scmp.eq.s32.totalorder %s1165_s18, 0 }
   0xb   : > { %p1513_p4 = por %p48_p2, %p47_p1  ;;  %s35_s23 = ssub.s32 %s1437_s16, %s1897_s20 }
   0xc   : > { %p121_p6 = scmp.eq.s32.totalorder %s1165_s18, 1  ;;  %p38_p7 = scmp.eq.s32.totalorder %s35_s23, 0 }
   0xd   : > { %p1519_p8 = por %p54_p5, %p53_p3  ;;  %p127_p10 = scmp.eq.s32.totalorder %s1166_s19, 1 }
   0xe   : > { %p1523_p9 = por %p121_p6, %p47_p1  ;;  %p1272_p13 = scmp.lt.s32.totalorder %s1441_s17, 2 }
   0xf   : > { %s1528_s26 = scalar_select %p38_p7, %s1429_s14, %s40_s21  }
  0x10   : > { %p1530_p11 = por %p127_p10, %p53_p3  ;;  %s153_s28 = sand.u32 1, %s1429_s14  }
  0x11   : > { %s1169_s29 = sshll.u32 %s153_s28, 7  ;;  %s1258_s30 = sshll.u32 %s1437_s16, 11 }
  0x12   : > { %s165_s6 = scalar_lea.hbm %s1881_s0, %s1258_s30  ;;  %s157_s7 = scalar_lea.vmem [#allocation2], %s1169_s29 }
  0x13   : > { %s166_s8 = sshll.u32 %s157_s7, 4  ;;  %p1543_p0 = pnand %p1272_p13, %p1513_p4  ;;  %s167_s8 = int_to_ptr.vmem [resolvable:$true] %s166_s8 }
  0x14   : > { %p1172_p1 = scmp.ge.s32.totalorder %s1441_s17, 1  ;;  %s154_s10 = scalar_lea.sflag [#allocation3], %s153_s28 }
  0x15   : > { %p1335_p2 = pneg %p1543_p0  ;;  %s1346_s11 = scalar_lea.vmem %s167_s8, 2048 }
  0x16   : > { %p1347_p3 = scmp.ne.s32.totalorder %s167_s8, %s1346_s11  ;;  %s1443_s18 = smov [#allocation2]  }
  0x17   : > { %s1351_s19 = sshll.u32 %s1443_s18, 4  ;;  %s1352_s19 = int_to_ptr.vmem [resolvable:$false] %s1351_s19 }
  0x18   : > { %p1349_p5 = pnand %p1347_p3, %p1335_p2  ;;  %s1353_s21 = scalar_lea.vmem %s1352_s19, 4096 }
  0x19   : > { %p1354_p7 = scmp.lt.s32.totalorder %s167_s8, %s1352_s19  ;;  %p1355_p10 = scmp.lt.s32.totalorder %s1353_s21, %s1346_s11 }
  0x1a   : > { %p1350_p6 = pneg %p1349_p5 }
  0x1b   : > { %p1356_p12 = por %p1355_p10, %p1354_p7 }
  0x1d   : > { %p1357_p4 = pnand %p1356_p12, %p1350_p6 }
  0x1f   : > { %1360 = shalt.err (!%p1357_p4)
}
  0x20   : > { %s1444_s22 = smov 256   ;;  %s1445_s23 = smov 16  }
  0x21   : > { %1267 = dma.hbm_to_vmem [thread:$0]  (!%p1543_p0), %s165_s6, 2048, %s167_s8, %s154_s10, %s1444_s22, %s1444_s22, %s1445_s23  }
  0x22   : > { %p174_p13 = scmp.lt.s32.totalorder %s1441_s17, 3 }
  0x24   : > { %p175_p2 = pnand %p1172_p1, %p174_p13 }
  0x25   : > { %s1556_s28 = sand.u32 (!%p175_p2), 1, %s1425_s13  }
  0x26   : > { %178 = sbr.rel (%p175_p2) target bundleno = 451 (0x1c3), region = 32  ;;  %s1173_s29 = sshll.u32 (!%p175_p2), %s1556_s28, 7 }
  0x27   : > { %s181_s30 = scalar_lea.sflag (!%p175_p2), [#allocation3], %s1556_s28  ;;  %s1560_s4 = scalar_lea.vmem (!%p175_p2), [#allocation2], %s1173_s29 }
  0x2b   : > { %1412 = dma.done.wait (%p1519_p8), %s181_s30, 2048  }
  0x2c   : > { %1414 = vsyncadd (%p1519_p8), %s181_s30, 4294965248  ;;  %v1446_v0 = vmov 0   ;;  %v1573_v1 = vld [vmem:[%s1882_s1] sm:$0xff]   ;;  %v1578_v2 = vld [vmem:[%s1882_s1 + $0x8] sm:$0xff]   ;;  %s1447_s8 = smov 124   ;;  %s1448_s9 = smov 126  }
  0x2d   : > { %388 = vmatprep.mubr.bf16.mxu1 %v1446_v0  ;;  %308 = vmatprep.mubr.bf16.mxu0 %v1446_v0  ;;  %v1181_v3 = vld [vmem:[%s1560_s4 + $0x28] sm:$0x3]  ;;  %vm349_vm0 = vcmask 1040384   ;;  %v1180_v4 = vld [vmem:[%s1560_s4 + $0x20] sm:$0x3]  ;;  %v241_v12 = vld [vmem:[%s1560_s4 + $0x18] sm:$0xff] }
  0x2e   : > { %1329 = vset.pattern.permute.xlu0 %v1446_v0  ;;  %1330 = vset.pattern.permute.xlu1 %v1446_v0  ;;  %v341_v5 = vpack.c.bf16 %v1181_v3, %v1181_v3  ;;  %v340_v6 = vpack.c.bf16 %v1180_v4, %v1180_v4  ;;  %v1193_v7 = vld [vmem:[%s1560_s4 + $0x48] sm:$0x3]  ;;  %v1192_v8 = vld [vmem:[%s1560_s4 + $0x40] sm:$0x3]  ;;  %v239_v9 = vld [vmem:[%s1560_s4 + $0x8] sm:$0xf0] }
  0x2f   : > { %254 = vrot.lane.b32.xlu0 %v1573_v1, %s1447_s8  ;;  %578 = vrot.lane.b32.xlu1 %v1573_v1, %s1448_s9  ;;  %v506_v10 = vpack.c.bf16 %v1193_v7, %v1193_v7  ;;  %v505_v11 = vpack.c.bf16 %v1192_v8, %v1192_v8  ;;  %v238_v13 = vld [vmem:[%s1560_s4] sm:$0xf0]  ;;  %v240_v14 = vld [vmem:[%s1560_s4 + $0x10] sm:$0xff]  ;;  %v243_v16 = vpack.c.bf16 %v241_v12, %v239_v9  ;;  %vm269_vm1 = vcmask 1045504   ;;  %s1174_s30 = sshll.u32 %s1556_s28, 8  ;;  %s1259_s5 = sshll.u32 %s1433_s15, 12 }
  0x30   : > { %1182 = vmatprep.subr.msk.bf16.mxu1 %vm349_vm0, %v341_v5  ;;  %v351_v15 = vsel %vm349_vm0, %v340_v6, 0  ;;  %v242_v17 = vpack.c.bf16 %v240_v14, %v238_v13  ;;  %v1209_v18 = vld [vmem:[%s1560_s4 + $0x48] sm:$0xf0]  ;;  %v1211_v19 = vld [vmem:[%s1560_s4 + $0x58] sm:$0xff]  ;;  %vm342_vm2 = vcmask 15360   ;;  %v1210_v31 = vld [vmem:[%s1560_s4 + $0x50] sm:$0xff] }
  0x31   : > { %v673_v20 = vpack.c.bf16 %v1211_v19, %v1209_v18  ;;  %v1186_v21 = vld [vmem:[%s1560_s4 + $0x28] sm:$0xf0]  ;;  %371 = vmatpush1.bf16.msra.mxu1 %v351_v15  ;;  %v261_v22 = vrot.slane %v243_v16, 2  ;;  %v1188_v24 = vld [vmem:[%s1560_s4 + $0x38] sm:$0xff]  ;;  %v508_v25 = vsel %vm349_vm0, %v505_v11, 0  ;;  %v214_v38 = vld [vmem:[%s1883_s2] sm:$0xff] }
  0x32   : > { %v260_v23 = vrot.slane %v242_v17, 2  ;;  %1194 = vmatprep.subr.msk.bf16.mxu1 %vm349_vm0, %v506_v10  ;;  %v430_v27 = vpack.c.bf16 %v1188_v24, %v1186_v21  ;;  %v1208_v30 = vld [vmem:[%s1560_s4 + $0x40] sm:$0xf0]  ;;  %v1221_v33 = vld [vmem:[%s1560_s4 + $0x28] sm:$0xc]  ;;  %v217_v40 = vld [vmem:[%s1883_s2 + $0x18] sm:$0xff] }
  0x33   : > { %256 = vrot.lane.b32.xlu0 %v1578_v2, %s1447_s8  ;;  %580 = vrot.lane.b32.xlu1 %v1578_v2, %s1448_s9  ;;  %v677_v26 = vrot.slane %v673_v20, 2  ;;  %v672_v32 = vpack.c.bf16 %v1210_v31, %v1208_v30  ;;  %v820_v35 = vpack.c.bf16 %v1221_v33, %v1221_v33  ;;  %v215_v39 = vld [vmem:[%s1883_s2 + $0x8] sm:$0xff]  ;;  %v216_v41 = vld [vmem:[%s1883_s2 + $0x10] sm:$0xff]  ;;  %vm262_vm3 = vcmask 97280   ;;  %s1829_s8 = scalar_lea.hbm %s1884_s3, %s1259_s5  ;;  %s1063_s15 = scalar_lea.sflag [#allocation4], %s1556_s28 }
  0x34   : > { %1177 = vmatprep.subr.msk.bf16.mxu0 %vm269_vm1, %v261_v22  ;;  %v271_v28 = vsel %vm269_vm1, %v260_v23, 0  ;;  %1183 = vmatmul.mubr.msk.bf16.vlgmr.msra.gmra.mxu1 %vm342_vm2, %v1573_v1  ;;  %v434_v29 = vrot.slane %v430_v27, 2  ;;  %v1185_v42 = vld [vmem:[%s1560_s4 + $0x20] sm:$0xf0]  ;;  %v1187_v43 = vld [vmem:[%s1560_s4 + $0x30] sm:$0xff]  ;;  %v1236_v12 = vld [vmem:[%s1560_s4 + $0x78] sm:$0xff] }
  0x35   : > { %291 = vmatpush1.bf16.msra.mxu0 %v271_v28  ;;  %398 = vmatprep.mubr.bf16.mxu1 %v1446_v0  ;;  %v676_v34 = vrot.slane %v672_v32, 2  ;;  %v824_v37 = vrot.slane %v820_v35, 1  ;;  %v1220_v44 = vld [vmem:[%s1560_s4 + $0x20] sm:$0xc]  ;;  %v429_v45 = vpack.c.bf16 %v1187_v43, %v1185_v42  ;;  %v575_v47 = vld [vmem:[%s1560_s4 + $0x8] sm:$0xc] }
  0x36   : > { %528 = vmatpush1.bf16.msra.mxu1 %v508_v25  ;;  %1189 = vmatprep.subr.msk.bf16.mxu0 %vm269_vm1, %v434_v29  ;;  %v819_v46 = vpack.c.bf16 %v1220_v44, %v1220_v44  ;;  %v1241_v48 = vld [vmem:[%s1560_s4 + $0x48] sm:$0xc]  ;;  %v577_v51 = vpack.c.bf16 %v575_v47, %v575_v47  ;;  %v574_v58 = vld [vmem:[%s1560_s4] sm:$0xc]  ;;  %v1216_v4 = vld [vmem:[%s1560_s4 + $0x68] sm:$0x3] }
  0x37   : > { %1212 = vmatprep.subr.msk.bf16.mxu1 %vm269_vm1, %v677_v26  ;;  %v679_v36 = vsel %vm269_vm1, %v676_v34, 0  ;;  %220 = vperm.xlu0 %1329, %v214_v38   ;;  %v433_v49 = vrot.slane %v429_v45, 2  ;;  %v981_v52 = vpack.c.bf16 %v1241_v48, %v1241_v48  ;;  %v1240_v59 = vld [vmem:[%s1560_s4 + $0x40] sm:$0xc]  ;;  %v576_v61 = vpack.c.bf16 %v574_v58, %v574_v58  ;;  %v1215_v10 = vld [vmem:[%s1560_s4 + $0x60] sm:$0x3] }
  0x38   : > { %225 = vperm.xlu1 %1330, %v215_v39   ;;  %v823_v50 = vrot.slane %v819_v46, 1  ;;  %v585_v56 = vrot.slane %v577_v51, 1  ;;  %v980_v62 = vpack.c.bf16 %v1240_v59, %v1240_v59  ;;  %v749_v8 = vpack.c.bf16 %v1216_v4, %v1216_v4  ;;  %v1234_v11 = vld [vmem:[%s1560_s4 + $0x68] sm:$0xf0]  ;;  %v1233_v17 = vld [vmem:[%s1560_s4 + $0x60] sm:$0xf0] }
  0x39   : > { %v436_v53 = vsel %vm269_vm1, %v433_v49, 0  ;;  %v985_v57 = vrot.slane %v981_v52, 1  ;;  %v584_v63 = vrot.slane %v576_v61, 1  ;;  %v748_v13 = vpack.c.bf16 %v1215_v10, %v1215_v10  ;;  %v1235_v18 = vld [vmem:[%s1560_s4 + $0x70] sm:$0xff]  ;;  %s1723_s4 = scalar_lea.vmem [#allocation5], %s1174_s30  ;;  %s1449_s10 = smov [#allocation5]  }
  0x3a   : > { %v826_v55 = vsel %vm349_vm0, %v823_v50, 0  ;;  %v984_v3 = vrot.slane %v980_v62, 1  ;;  %v906_v14 = vpack.c.bf16 %v1236_v12, %v1234_v11  ;;  %v905_v19 = vpack.c.bf16 %v1235_v18, %v1233_v17  ;;  %s1078_s6 = sshll.u32 %s1723_s4, 4  ;;  %s1365_s11 = sshll.u32 %s1449_s10, 4  ;;  %s1831_s6 = int_to_ptr.vmem [resolvable:$true] %s1078_s6  ;;  %s1366_s11 = int_to_ptr.vmem [resolvable:$false] %s1365_s11 }
  0x3b   : > { %235 = vperm.xlu0 %1329, %v217_v40   ;;  %v593_v6 = vsel %vm349_vm0, %v584_v63, 0  ;;  %v751_v15 = vsel %vm349_vm0, %v748_v13, 0  ;;  %s1361_s9 = scalar_lea.vmem %s1831_s6, 4096  ;;  %s1367_s18 = scalar_lea.vmem %s1366_s11, 8192 }
  0x3c   : > { %1184 = vmatmul.mubr.msk.bf16.gmra.mxu1 %vm342_vm2, %v1578_v2  ;;  %230 = vperm.xlu1 %1330, %v216_v41   ;;  %v987_v7 = vsel %vm349_vm0, %v984_v3, 0  ;;  %v910_v16 = vrot.slane %v906_v14, 2  ;;  %v909_v20 = vrot.slane %v905_v19, 2  ;;  %p1362_p8 = scmp.ne.s32.totalorder %s1831_s6, %s1361_s9  ;;  %p1368_p1 = scmp.lt.s32.totalorder %s1831_s6, %s1366_s11 }
  0x3d   : > { %545 = vmatprep.mubr.bf16.mxu1 %v1446_v0  ;;  %p1369_p3 = scmp.lt.s32.totalorder %s1367_s18, %s1361_s9 }
  0x3e   : > { %v912_v21 = vsel %vm269_vm1, %v909_v20, 0  ;;  %p1363_p12 = pnand %p1362_p8, %p1523_p9 }
  0x3f   : > { %p1370_p5 = por %p1369_p3, %p1368_p1 }
  0x40   : > { %p1364_p0 = pneg %p1363_p12 }
  0x42   : > { %p1371_p6 = pnand %p1370_p5, %p1364_p0 }
  0x44   : > { %1195 = vmatmul.mubr.msk.bf16.vlgmr.msra.gmra.mxu1 %vm342_vm2, %v1573_v1 }
  0x45   : > { %555 = vmatprep.mubr.bf16.mxu1 %v1446_v0  ;;  %699 = vmatpush1.bf16.msra.mxu1 %v679_v36 }
  0x46   : > { %1222 = vmatprep.subr.msk.bf16.mxu1 %vm349_vm0, %v824_v37 }
  0x4c   : > { %1196 = vmatmul.mubr.msk.bf16.gmra.mxu1 %vm342_vm2, %v1578_v2 }
  0x4d   : > { %716 = vmatprep.mubr.bf16.mxu1 %v1446_v0 }
  0xa1   : > { %v1639_v54 = vpop.permute.xlu0 %254  ;;  %v579_v5 = vpop.permute.xlu1 %578 }
  0xa2   : > { %1178 = vmatmul.mubr.msk.bf16.vlgmr.msra.gmra.mxu0 %vm262_vm3, %v1639_v54  ;;  %1213 = vmatmul.mubr.msk.bf16.vlgmr.msra.gmra.mxu1 %vm262_vm3, %v1639_v54 }
  0xa3   : > { %456 = vmatpush1.bf16.msra.mxu0 %v436_v53  ;;  %318 = vmatprep.mubr.bf16.mxu0 %v1446_v0 }
  0xa4   : > { %726 = vmatprep.mubr.bf16.mxu1 %v1446_v0  ;;  %846 = vmatpush1.bf16.msra.mxu1 %v826_v55 }
  0xa5   : > { %1197 = vmatprep.subr.msk.bf16.mxu0 %vm349_vm0, %v585_v56  ;;  %1242 = vmatprep.subr.msk.bf16.mxu1 %vm349_vm0, %v985_v57  ;;  %v257_v60 = vpop.permute.xlu0 %256  ;;  %v581_v9 = vpop.permute.xlu1 %580 }
  0xaa   : > { %1179 = vmatmul.mubr.msk.bf16.gmra.mxu0 %vm262_vm3, %v257_v60  ;;  %1214 = vmatmul.mubr.msk.bf16.gmra.mxu1 %vm262_vm3, %v257_v60 }
  0xab   : > { %473 = vmatprep.mubr.bf16.mxu0 %v1446_v0  ;;  %863 = vmatprep.mubr.bf16.mxu1 %v1446_v0 }
  0xb2   : > { %1190 = vmatmul.mubr.msk.bf16.vlgmr.msra.gmra.mxu0 %vm262_vm3, %v1639_v54  ;;  %1223 = vmatmul.mubr.msk.bf16.vlgmr.msra.gmra.mxu1 %vm342_vm2, %v579_v5  ;;  %v1710_v35 = vpop.permute.xlu0 %220 }
  0xb3   : > { %613 = vmatpush1.bf16.msra.mxu0 %v593_v6  ;;  %483 = vmatprep.mubr.bf16.mxu0 %v1446_v0  ;;  %v1713_v36 = vpop.permute.xlu1 %225 }
  0xb4   : > { %873 = vmatprep.mubr.bf16.mxu1 %v1446_v0  ;;  %1007 = vmatpush1.bf16.msra.mxu1 %v987_v7 }
  0xb5   : > { %1217 = vmatprep.subr.msk.bf16.mxu0 %vm349_vm0, %v749_v8 }
  0xb6   : > { %v1737_v57 = vpop.permute.xlu0 %235 }
  0xb7   : > { %v1727_v48 = vpop.permute.xlu1 %230 }
  0xba   : > { %1191 = vmatmul.mubr.msk.bf16.gmra.mxu0 %vm262_vm3, %v257_v60  ;;  %1224 = vmatmul.mubr.msk.bf16.gmra.mxu1 %vm342_vm2, %v581_v9 }
  0xbb   : > { %630 = vmatprep.mubr.bf16.mxu0 %v1446_v0  ;;  %1024 = vmatprep.mubr.bf16.mxu1 %v1446_v0 }
  0xc2   : > { %1198 = vmatmul.mubr.msk.bf16.vlgmr.msra.gmra.mxu0 %vm342_vm2, %v579_v5  ;;  %1243 = vmatmul.mubr.msk.bf16.vlgmr.msra.gmra.mxu1 %vm342_vm2, %v579_v5 }
  0xc3   : > { %771 = vmatpush1.bf16.msra.mxu0 %v751_v15  ;;  %640 = vmatprep.mubr.bf16.mxu0 %v1446_v0 }
  0xc4   : > { %1034 = vmatprep.mubr.bf16.mxu1 %v1446_v0  ;;  %1237 = vmatprep.subr.msk.bf16.mxu0 %vm269_vm1, %v910_v16 }
  0xca   : > { %1199 = vmatmul.mubr.msk.bf16.gmra.mxu0 %vm342_vm2, %v581_v9  ;;  %1244 = vmatmul.mubr.msk.bf16.gmra.mxu1 %vm342_vm2, %v581_v9 }
  0xcb   : > { %788 = vmatprep.mubr.bf16.mxu0 %v1446_v0 }
  0xd2   : > { %1218 = vmatmul.mubr.msk.bf16.vlgmr.msra.gmra.mxu0 %vm342_vm2, %v1573_v1 }
  0xd3   : > { %932 = vmatpush1.bf16.msra.mxu0 %v912_v21  ;;  %798 = vmatprep.mubr.bf16.mxu0 %v1446_v0 }
  0xda   : > { %1219 = vmatmul.mubr.msk.bf16.gmra.mxu0 %vm342_vm2, %v1578_v2 }
  0xdb   : > { %949 = vmatprep.mubr.bf16.mxu0 %v1446_v0 }
  0xe2   : > { %1238 = vmatmul.mubr.msk.bf16.vlgmr.msra.gmra.mxu0 %vm262_vm3, %v1639_v54 }
  0xe3   : > { %959 = vmatprep.mubr.bf16.mxu0 %v1446_v0 }
  0xea   : > { %1239 = vmatmul.mubr.msk.bf16.gmra.mxu0 %vm262_vm3, %v257_v60 }
  0xf4   : > { %v390_v22 = vpop.f32.mrf.mxu1 }
  0xf6   : > { %v392_v23 = vpop.f32.mrf.mxu1 }
  0xf8   : > { %v394_v24 = vpop.f32.mrf.mxu1 }
  0xfa   : > { %v396_v1 = vpop.f32.mrf.mxu1 }
  0xfc   : > { %v400_v25 = vpop.f32.mrf.mxu1 }
  0xfe   : > { %v402_v26 = vpop.f32.mrf.mxu1 }
 0x100   : > { %v404_v27 = vpop.f32.mrf.mxu1 }
 0x102   : > { %v406_v28 = vpop.f32.mrf.mxu1 }
 0x104   : > { %v1694_v29 = vpop.f32.mrf.mxu1 }
 0x106   : > { %v1696_v2 = vpop.f32.mrf.mxu1 }
 0x108   : > { %v1698_v30 = vpop.f32.mrf.mxu1 }
 0x10a   : > { %v1700_v31 = vpop.f32.mrf.mxu1 }
 0x10c   : > { %v1702_v0 = vpop.f32.mrf.mxu1 }
 0x10e   : > { %v1704_v32 = vpop.f32.mrf.mxu1 }
 0x110   : > { %v1706_v33 = vpop.f32.mrf.mxu1 }
 0x112   : > { %v1708_v34 = vpop.f32.mrf.mxu1 }
 0x162   : > { %v310_v37 = vpop.f32.mrf.mxu0  ;;  %v1715_v38 = vpop.f32.mrf.mxu1 }
 0x163   : > { %v329_v39 = vadd.f32 %v310_v37, %v1710_v35 }
 0x164   : > { %v312_v40 = vpop.f32.mrf.mxu0  ;;  %v1718_v41 = vpop.f32.mrf.mxu1 }
 0x165   : > { %v409_v42 = vadd.f32 %v390_v22, %v329_v39  ;;  %v330_v43 = vadd.f32 %v312_v40, %v1710_v35 }
 0x166   : > { %v314_v44 = vpop.f32.mrf.mxu0  ;;  %v1721_v45 = vpop.f32.mrf.mxu1 }
 0x167   : > { %417 = vst [vmem:[%s1723_s4] sm:$0xff] %v409_v42  ;;  %v410_v46 = vadd.f32 %v392_v23, %v330_v43  ;;  %v331_v47 = vadd.f32 %v314_v44, %v1713_v36 }
 0x168   : > { %v316_v49 = vpop.f32.mrf.mxu0  ;;  %v1729_v50 = vpop.f32.mrf.mxu1 }
 0x169   : > { %418 = vst [vmem:[%s1723_s4 + $0x8] sm:$0xff] %v410_v46  ;;  %v411_v51 = vadd.f32 %v394_v24, %v331_v47  ;;  %v332_v52 = vadd.f32 %v316_v49, %v1713_v36 }
 0x16a   : > { %v320_v53 = vpop.f32.mrf.mxu0  ;;  %v1733_v54 = vpop.f32.mrf.mxu1 }
 0x16b   : > { %419 = vst [vmem:[%s1723_s4 + $0x10] sm:$0xff] %v411_v51  ;;  %v412_v55 = vadd.f32 %v396_v1, %v332_v52  ;;  %v333_v56 = vadd.f32 %v320_v53, %v1727_v48 }
 0x16c   : > { %v322_v58 = vpop.f32.mrf.mxu0  ;;  %v1739_v59 = vpop.f32.mrf.mxu1 }
 0x16d   : > { %420 = vst [vmem:[%s1723_s4 + $0x18] sm:$0xff] %v412_v55  ;;  %v413_v60 = vadd.f32 %v400_v25, %v333_v56  ;;  %v334_v61 = vadd.f32 %v322_v58, %v1727_v48 }
 0x16e   : > { %v324_v62 = vpop.f32.mrf.mxu0  ;;  %v1743_v63 = vpop.f32.mrf.mxu1 }
 0x16f   : > { %421 = vst [vmem:[%s1723_s4 + $0x20] sm:$0xff] %v413_v60  ;;  %v414_v3 = vadd.f32 %v402_v26, %v334_v61  ;;  %v335_v4 = vadd.f32 %v324_v62, %v1737_v57 }
 0x170   : > { %v326_v5 = vpop.f32.mrf.mxu0  ;;  %v1749_v8 = vpop.f32.mrf.mxu1 }
 0x171   : > { %422 = vst [vmem:[%s1723_s4 + $0x28] sm:$0xff] %v414_v3  ;;  %v415_v6 = vadd.f32 %v404_v27, %v335_v4  ;;  %v336_v7 = vadd.f32 %v326_v5, %v1737_v57 }
 0x172   : > { %v475_v9 = vpop.f32.mrf.mxu0  ;;  %v865_v12 = vpop.f32.mrf.mxu1 }
 0x173   : > { %423 = vst [vmem:[%s1723_s4 + $0x30] sm:$0xff] %v415_v6  ;;  %v416_v10 = vadd.f32 %v406_v28, %v336_v7  ;;  %v494_v18 = vadd.f32 %v475_v9, %v1710_v35  ;;  %v737_v6 = vadd.f32 %v1715_v38, %v1710_v35  ;;  %v740_v38 = vadd.f32 %v1729_v50, %v1713_v36 }
 0x174   : > { %v477_v11 = vpop.f32.mrf.mxu0  ;;  %v1753_v15 = vpop.f32.mrf.mxu1 }
 0x175   : > { %424 = vst [vmem:[%s1723_s4 + $0x38] sm:$0xff] %v416_v10  ;;  %v495_v21 = vadd.f32 %v477_v11, %v1710_v35  ;;  %v566_v24 = vadd.f32 %v1694_v29, %v494_v18  ;;  %v738_v10 = vadd.f32 %v1718_v41, %v1710_v35 }
 0x176   : > { %v479_v13 = vpop.f32.mrf.mxu0  ;;  %v1756_v19 = vpop.f32.mrf.mxu1 }
 0x177   : > { %v496_v23 = vadd.f32 %v479_v13, %v1713_v36  ;;  %v567_v28 = vadd.f32 %v1696_v2, %v495_v21  ;;  %v739_v13 = vadd.f32 %v1721_v45, %v1713_v36  ;;  %v741_v21 = vadd.f32 %v1733_v54, %v1727_v48 }
 0x178   : > { %v481_v14 = vpop.f32.mrf.mxu0  ;;  %v1761_v1 = vpop.f32.mrf.mxu1 }
 0x179   : > { %v497_v26 = vadd.f32 %v481_v14, %v1713_v36  ;;  %v568_v42 = vadd.f32 %v1698_v30, %v496_v23 }
 0x17a   : > { %v485_v16 = vpop.f32.mrf.mxu0  ;;  %v875_v43 = vpop.f32.mrf.mxu1 }
 0x17b   : > { %v498_v39 = vadd.f32 %v485_v16, %v1727_v48  ;;  %v569_v47 = vadd.f32 %v1700_v31, %v497_v26  ;;  %v743_v26 = vadd.f32 %v1743_v63, %v1737_v57 }
 0x17c   : > { %v487_v17 = vpop.f32.mrf.mxu0  ;;  %v877_v53 = vpop.f32.mrf.mxu1 }
 0x17d   : > { %v499_v29 = vadd.f32 %v487_v17, %v1727_v48  ;;  %v570_v52 = vadd.f32 %v1702_v0, %v498_v39 }
 0x17e   : > { %v489_v20 = vpop.f32.mrf.mxu0  ;;  %v879_v62 = vpop.f32.mrf.mxu1 }
 0x17f   : > { %v500_v2 = vadd.f32 %v489_v20, %v1737_v57  ;;  %v571_v58 = vadd.f32 %v1704_v32, %v499_v29 }
 0x180   : > { %v491_v22 = vpop.f32.mrf.mxu0  ;;  %v881_v32 = vpop.f32.mrf.mxu1 }
 0x181   : > { %v501_v30 = vadd.f32 %v491_v22, %v1737_v57  ;;  %v572_v61 = vadd.f32 %v1706_v33, %v500_v2 }
 0x182   : > { %v632_v25 = vpop.f32.mrf.mxu0  ;;  %v1026_v16 = vpop.f32.mrf.mxu1 }
 0x183   : > { %v651_v27 = vadd.f32 %v632_v25, %v566_v24  ;;  %v573_v0 = vadd.f32 %v1708_v34, %v501_v30  ;;  %v742_v24 = vadd.f32 %v1739_v59, %v1727_v48 }
 0x184   : > { %v634_v37 = vpop.f32.mrf.mxu0  ;;  %v1028_v22 = vpop.f32.mrf.mxu1 }
 0x185   : > { %1200 = vst [vmem:[%s1723_s4 + $0x40] sm:$0xff] %v651_v27  ;;  %v652_v40 = vadd.f32 %v634_v37, %v567_v28  ;;  %v744_v37 = vadd.f32 %v1749_v8, %v1737_v57 }
 0x186   : > { %v636_v44 = vpop.f32.mrf.mxu0  ;;  %v1030_v27 = vpop.f32.mrf.mxu1 }
 0x187   : > { %1201 = vst [vmem:[%s1723_s4 + $0x48] sm:$0xff] %v652_v40  ;;  %v653_v46 = vadd.f32 %v636_v44, %v568_v42 }
 0x188   : > { %v638_v49 = vpop.f32.mrf.mxu0  ;;  %v1032_v63 = vpop.f32.mrf.mxu1 }
 0x189   : > { %1202 = vst [vmem:[%s1723_s4 + $0x50] sm:$0xff] %v653_v46  ;;  %v654_v51 = vadd.f32 %v638_v49, %v569_v47 }
 0x18a   : > { %v642_v55 = vpop.f32.mrf.mxu0  ;;  %v1036_v49 = vpop.f32.mrf.mxu1 }
 0x18b   : > { %1203 = vst [vmem:[%s1723_s4 + $0x58] sm:$0xff] %v654_v51  ;;  %v655_v56 = vadd.f32 %v642_v55, %v570_v52 }
 0x18c   : > { %v644_v60 = vpop.f32.mrf.mxu0 }
 0x18d   : > { %1204 = vst [vmem:[%s1723_s4 + $0x60] sm:$0xff] %v655_v56  ;;  %v656_v31 = vadd.f32 %v644_v60, %v571_v58  ;;  %v1038_v56 = vpop.f32.mrf.mxu1 }
 0x18e   : > { %v646_v3 = vpop.f32.mrf.mxu0 }
 0x18f   : > { %1205 = vst [vmem:[%s1723_s4 + $0x68] sm:$0xff] %v656_v31  ;;  %v657_v4 = vadd.f32 %v646_v3, %v572_v61  ;;  %v1040_v3 = vpop.f32.mrf.mxu1 }
 0x190   : > { %v648_v5 = vpop.f32.mrf.mxu0 }
 0x191   : > { %1206 = vst [vmem:[%s1723_s4 + $0x70] sm:$0xff] %v657_v4  ;;  %v658_v7 = vadd.f32 %v648_v5, %v573_v0 }
 0x192   : > { %v790_v9 = vpop.f32.mrf.mxu0 }
 0x193   : > { %1207 = vst [vmem:[%s1723_s4 + $0x78] sm:$0xff] %v658_v7  ;;  %v809_v33 = vadd.f32 %v790_v9, %v737_v6 }
 0x194   : > { %v792_v11 = vpop.f32.mrf.mxu0 }
 0x195   : > { %v884_v34 = vadd.f32 %v865_v12, %v809_v33  ;;  %v810_v14 = vadd.f32 %v792_v11, %v738_v10 }
 0x196   : > { %v794_v17 = vpop.f32.mrf.mxu0 }
 0x197   : > { %1225 = vst [vmem:[%s1723_s4 + $0x80] sm:$0xff] %v884_v34  ;;  %v885_v18 = vadd.f32 %v1753_v15, %v810_v14  ;;  %v811_v20 = vadd.f32 %v794_v17, %v739_v13 }
 0x198   : > { %v796_v41 = vpop.f32.mrf.mxu0 }
 0x199   : > { %1226 = vst [vmem:[%s1723_s4 + $0x88] sm:$0xff] %v885_v18  ;;  %v886_v45 = vadd.f32 %v1756_v19, %v811_v20  ;;  %v812_v12 = vadd.f32 %v796_v41, %v740_v38 }
 0x19a   : > { %v800_v23 = vpop.f32.mrf.mxu0 }
 0x19b   : > { %1227 = vst [vmem:[%s1723_s4 + $0x90] sm:$0xff] %v886_v45  ;;  %v887_v50 = vadd.f32 %v1761_v1, %v812_v12  ;;  %v813_v15 = vadd.f32 %v800_v23, %v741_v21 }
 0x19c   : > { %v802_v25 = vpop.f32.mrf.mxu0 }
 0x19d   : > { %1228 = vst [vmem:[%s1723_s4 + $0x98] sm:$0xff] %v887_v50  ;;  %v888_v54 = vadd.f32 %v875_v43, %v813_v15  ;;  %v814_v19 = vadd.f32 %v802_v25, %v742_v24 }
 0x19e   : > { %v804_v28 = vpop.f32.mrf.mxu0 }
 0x19f   : > { %1229 = vst [vmem:[%s1723_s4 + $0xa0] sm:$0xff] %v888_v54  ;;  %v889_v59 = vadd.f32 %v877_v53, %v814_v19  ;;  %v815_v39 = vadd.f32 %v804_v28, %v743_v26 }
 0x1a0   : > { %v806_v1 = vpop.f32.mrf.mxu0 }
 0x1a1   : > { %1230 = vst [vmem:[%s1723_s4 + $0xa8] sm:$0xff] %v889_v59  ;;  %v890_v40 = vadd.f32 %v879_v62, %v815_v39  ;;  %v816_v42 = vadd.f32 %v806_v1, %v744_v37 }
 0x1a2   : > { %v951_v44 = vpop.f32.mrf.mxu0 }
 0x1a3   : > { %1231 = vst [vmem:[%s1723_s4 + $0xb0] sm:$0xff] %v890_v40  ;;  %v891_v43 = vadd.f32 %v881_v32, %v816_v42  ;;  %v970_v29 = vadd.f32 %v951_v44, %v1710_v35  ;;  %v1042_v32 = vpop.f32.mrf.mxu1 }
 0x1a4   : > { %v953_v46 = vpop.f32.mrf.mxu0 }
 0x1a5   : > { %1232 = vst [vmem:[%s1723_s4 + $0xb8] sm:$0xff] %v891_v43  ;;  %v1045_v47 = vadd.f32 %v1026_v16, %v970_v29  ;;  %v971_v8 = vadd.f32 %v953_v46, %v1710_v35 }
 0x1a6   : > { %v955_v2 = vpop.f32.mrf.mxu0 }
 0x1a7   : > { %1245 = vst [vmem:[%s1723_s4 + $0xc0] sm:$0xff] %v1045_v47  ;;  %v1046_v51 = vadd.f32 %v1028_v22, %v971_v8  ;;  %v972_v52 = vadd.f32 %v955_v2, %v1713_v36 }
 0x1a8   : > { %v957_v53 = vpop.f32.mrf.mxu0 }
 0x1a9   : > { %1246 = vst [vmem:[%s1723_s4 + $0xc8] sm:$0xff] %v1046_v51  ;;  %v1047_v55 = vadd.f32 %v1030_v27, %v972_v52  ;;  %v973_v30 = vadd.f32 %v957_v53, %v1713_v36 }
 0x1aa   : > { %v961_v58 = vpop.f32.mrf.mxu0 }
 0x1ab   : > { %1247 = vst [vmem:[%s1723_s4 + $0xd0] sm:$0xff] %v1047_v55  ;;  %v1048_v35 = vadd.f32 %v1032_v63, %v973_v30  ;;  %v974_v60 = vadd.f32 %v961_v58, %v1727_v48 }
 0x1ac   : > { %v963_v31 = vpop.f32.mrf.mxu0 }
 0x1ad   : > { %1248 = vst [vmem:[%s1723_s4 + $0xd8] sm:$0xff] %v1048_v35  ;;  %v1049_v61 = vadd.f32 %v1036_v49, %v974_v60  ;;  %v975_v62 = vadd.f32 %v963_v31, %v1727_v48 }
 0x1ae   : > { %v965_v4 = vpop.f32.mrf.mxu0 }
 0x1af   : > { %1249 = vst [vmem:[%s1723_s4 + $0xe0] sm:$0xff] %v1049_v61  ;;  %v1050_v36 = vadd.f32 %v1038_v56, %v975_v62  ;;  %v976_v0 = vadd.f32 %v965_v4, %v1737_v57 }
 0x1b0   : > { %v967_v5 = vpop.f32.mrf.mxu0 }
 0x1b1   : > { %1250 = vst [vmem:[%s1723_s4 + $0xe8] sm:$0xff] %v1050_v36  ;;  %v1051_v6 = vadd.f32 %v1040_v3, %v976_v0  ;;  %v977_v7 = vadd.f32 %v967_v5, %v1737_v57 }
 0x1b3   : > { %1251 = vst [vmem:[%s1723_s4 + $0xf0] sm:$0xff] %v1051_v6  ;;  %v1052_v48 = vadd.f32 %v1042_v32, %v977_v7 }
 0x1b5   : > { %1252 = vst [vmem:[%s1723_s4 + $0xf8] sm:$0xff] %v1052_v48 }
 0x1b6   : > { %1374 = shalt.err (!%p1371_p6)
}
 0x1b7   : > { %s1375_s19 = scalar_lea.hbm %s1829_s8, 4096  ;;  %s1379_s23 = scalar_lea.hbm %s1884_s3, 8192 }
 0x1b8   : > { %p1376_p7 = scmp.ne.s32.totalorder %s1829_s8, %s1375_s19  ;;  %p1380_p13 = scmp.lt.s32.totalorder %s1829_s8, %s1884_s3 }
 0x1b9   : > { %p1381_p2 = scmp.lt.s32.totalorder %s1379_s23, %s1375_s19 }
 0x1ba   : > { %p1377_p10 = pnand %p1376_p7, %p1523_p9 }
 0x1bb   : > { %p1382_p8 = por %p1381_p2, %p1380_p13 }
 0x1bc   : > { %p1378_p4 = pneg %p1377_p10 }
 0x1be   : > { %p1383_p12 = pnand %p1382_p8, %p1378_p4 }
 0x1c0   : > { %1386 = shalt.err (!%p1383_p12)
}
 0x1c1   : > { %s1450_s4 = smov 256   ;;  %s1451_s5 = smov 16  }
 0x1c2   : > { %1262 = dma.vmem_to_hbm [thread:$0]  (%p1523_p9), %s1831_s6, 4096, %s1829_s8, %s1063_s15, %s1450_s4, %s1450_s4, %s1451_s5  }
 0x1c3 PF: > { %s1093_s24 = sand.u32 1, %s1421_s12   ;;  %p1890_p0 = scmp.ge.s32.totalorder %s1441_s17, 2 }
 0x1c4   : > { %s1094_s7 = scalar_lea.sflag [#allocation4], %s1093_s24 }
 0x1c5   : > { %p1269_p1 = pnand %p1890_p0, %p1530_p11 }
 0x1c7   : > { %p1270_p3 = pneg %p1269_p1 }
 0x1c9   : > { %1416 = dma.done.wait (%p1270_p3), %s1094_s7, 4096  }
 0x1ca   : > { %1418 = vsyncadd (%p1270_p3), %s1094_s7, 4294963200  ;;  %s19_s17 = sadd.s32 1, %s1441_s17   ;;  %s1891_s12 = smov %s1425_s13 }
 0x1cb   : > { %p16_p5 = scmp.ge.s32.totalorder %s19_s17, 4   ;;  %s1892_s13 = smov %s1429_s14 }
 0x1cc   : > { %s1893_s14 = smov %s1528_s26  ;;  %s1894_s15 = smov %s1437_s16 }
 0x1cd   : > { %s1895_s16 = smov %s1897_s20  ;;  %18 = sbr.rel (!%p16_p5) target bundleno = 6 (0x6), region = 83 }
 0x1d2   :  { %1099 = vsyncpa [#allocation3], 1 }
 0x1d3   :  { %1101 = vsyncpa [#allocation3 + $0x1], 1 }
 0x1d4   :  { %1102 = vsyncpa [#allocation4], 1 }
 0x1d5   :  { %1104 = vsyncpa [#allocation4 + $0x1], 1 }

</bundles_post_ra>
